<compile_context>
chip_gen: v7x
topology: tpu7x:2x2x1
jax: 0.10.0
libtpu: 0.0.40
codegen_flags: <defaults>
</compile_context>

<pallas_src>
import functools

import jax
import jax.numpy as jnp
from jax.experimental import pallas as pl
from jax.experimental.pallas import tpu as pltpu


def _fused_decoder_kernel(
    z_ref,
    w1_ref, b1_ref,
    w2_ref, b2_ref,
    w3_ref, b3_ref,
    w4_ref, b4_ref,
    o_ref,
    *,
    negative_slope: float,
):
    """Fused 4-layer MLP: three Linear+LeakyReLU stages and a final Linear.

    MXU matmuls with f32 accumulation, VPU bias add + leaky-relu select,
    single store of the final output tile. All intermediates stay on-chip.
    """

    def leaky(y):
        return jnp.where(y >= 0, y, negative_slope * y)

    h = z_ref[...]
    h = leaky(jnp.dot(h, w1_ref[...], preferred_element_type=jnp.float32) + b1_ref[...])
    h = leaky(jnp.dot(h, w2_ref[...], preferred_element_type=jnp.float32) + b2_ref[...])
    h = leaky(jnp.dot(h, w3_ref[...], preferred_element_type=jnp.float32) + b3_ref[...])
    y = jnp.dot(h, w4_ref[...], preferred_element_type=jnp.float32) + b4_ref[...]
    o_ref[...] = y.astype(o_ref.dtype)


def ae_decoder_forward(z_ae, params, *, batch_tile: int = 256,
                       negative_slope: float = 0.2):
    """Forward pass of AE_decoder as one fused Pallas kernel.

    z_ae:   (N, n_z)
    params: [(w1, b1), (w2, b2), (w3, b3), (w4, b4)] with w_i (d_in, d_out).
    Returns (N, n_input).
    """
    (w1, b1), (w2, b2), (w3, b3), (w4, b4) = params
    n, n_z = z_ae.shape
    d1 = w1.shape[1]
    d2 = w2.shape[1]
    d3 = w3.shape[1]
    d_out = w4.shape[1]

    # Batch tile: multiple of 8 (sublane alignment), capped at batch_tile.
    tb = min(batch_tile, n)
    tb = max(8, ((tb + 7) // 8) * 8)
    n_pad = ((n + tb - 1) // tb) * tb
    zp = z_ae if n_pad == n else jnp.pad(z_ae, ((0, n_pad - n), (0, 0)))

    grid = (n_pad // tb,)

    # 2-D bias tiles for VMEM.
    b1r = b1.reshape(1, d1)
    b2r = b2.reshape(1, d2)
    b3r = b3.reshape(1, d3)
    b4r = b4.reshape(1, d_out)

    def resident(shape):
        # Same block every grid step -> weights/biases stay VMEM-resident.
        return pl.BlockSpec(shape, lambda i: (0, 0))

    kernel = functools.partial(_fused_decoder_kernel, negative_slope=negative_slope)

    out = pl.pallas_call(
        kernel,
        out_shape=jax.ShapeDtypeStruct((n_pad, d_out), z_ae.dtype),
        grid=grid,
        in_specs=[
            pl.BlockSpec((tb, n_z), lambda i: (i, 0)),  # activations tile over batch
            resident((n_z, d1)), resident((1, d1)),
            resident((d1, d2)), resident((1, d2)),
            resident((d2, d3)), resident((1, d3)),
            resident((d3, d_out)), resident((1, d_out)),
        ],
        out_specs=pl.BlockSpec((tb, d_out), lambda i: (i, 0)),
        compiler_params=pltpu.CompilerParams(
            dimension_semantics=("parallel",),  # shard batch across TCs (v7x)
        ),
    )(zp, w1, b1r, w2, b2r, w3, b3r, w4, b4r)

    return out[:n] if n_pad != n else out


def init_ae_decoder_params(key, ae_n_dec_1, ae_n_dec_2, ae_n_dec_3, n_input, n_z,
                           dtype=jnp.float32):
    """Deterministic init matching PyTorch Linear's U(-1/sqrt(fan_in), 1/sqrt(fan_in))."""
    dims = [(n_z, ae_n_dec_1), (ae_n_dec_1, ae_n_dec_2),
            (ae_n_dec_2, ae_n_dec_3), (ae_n_dec_3, n_input)]
    params = []
    for (d_in, d_out) in dims:
        key, kw, kb = jax.random.split(key, 3)
        bound = 1.0 / jnp.sqrt(jnp.asarray(d_in, dtype=jnp.float32))
        w = jax.random.uniform(kw, (d_in, d_out), dtype=dtype, minval=-bound, maxval=bound)
        b = jax.random.uniform(kb, (d_out,), dtype=dtype, minval=-bound, maxval=bound)
        params.append((w, b))
    return params


def _reference_forward(z_ae, params):
    """Pure-JAX reference for correctness checking."""
    def leaky(x):
        return jnp.where(x >= 0, x, 0.2 * x)
    (w1, b1), (w2, b2), (w3, b3), (w4, b4) = params
    z = leaky(z_ae @ w1 + b1)
    z = leaky(z @ w2 + b2)
    z = leaky(z @ w3 + b3)
    return z @ w4 + b4


if __name__ == "__main__":
    # Small config consistent with AE_decoder(ae_n_dec_1, ae_n_dec_2, ae_n_dec_3, n_input, n_z)
    n_z = 32
    ae_n_dec_1 = 64
    ae_n_dec_2 = 64
    ae_n_dec_3 = 128
    n_input = 256

    key = jax.random.PRNGKey(0)
    key, kz1, kz2 = jax.random.split(key, 3)
    params = init_ae_decoder_params(key, ae_n_dec_1, ae_n_dec_2, ae_n_dec_3, n_input, n_z)

    # Case 1: tiny batch (single grid step, full-array blocks).
    z_small = jax.random.normal(kz1, (8, n_z), dtype=jnp.float32)
    x_small = jax.block_until_ready(ae_decoder_forward(z_small, params))
    assert x_small.shape == (8, n_input)
    assert jnp.allclose(x_small, _reference_forward(z_small, params),
                        atol=1e-4, rtol=1e-4), "mismatch vs reference (batch=8)"

    # Case 2: larger, non-multiple batch (exercises batch tiling + padding path).
    z_big = jax.random.normal(kz2, (300, n_z), dtype=jnp.float32)
    x_big = jax.block_until_ready(ae_decoder_forward(z_big, params))
    assert x_big.shape == (300, n_input)
    assert jnp.allclose(x_big, _reference_forward(z_big, params),
                        atol=1e-4, rtol=1e-4), "mismatch vs reference (batch=300)"

    print("KERNEL_OK")
</pallas_src>

<mosaic_0001>
module attributes {stable_mosaic.version = 11 : i64} {
  func.func @_fused_decoder_kernel(%arg0: i32, %arg1: memref<8x32xf32, #tpu.memory_space<vmem>>, %arg2: memref<32x64xf32, #tpu.memory_space<vmem>>, %arg3: memref<1x64xf32, #tpu.memory_space<vmem>>, %arg4: memref<64x64xf32, #tpu.memory_space<vmem>>, %arg5: memref<1x64xf32, #tpu.memory_space<vmem>>, %arg6: memref<64x128xf32, #tpu.memory_space<vmem>>, %arg7: memref<1x128xf32, #tpu.memory_space<vmem>>, %arg8: memref<128x256xf32, #tpu.memory_space<vmem>>, %arg9: memref<1x256xf32, #tpu.memory_space<vmem>>, %arg10: memref<8x256xf32, #tpu.memory_space<vmem>>) attributes {dimension_semantics = [#tpu.dimension_semantics<parallel>], iteration_bounds = array<i64: 1>, scalar_prefetch = 0 : i64, scratch_operands = 0 : i64, tpu.core_type = #tpu.core_type<tc>, window_params = [{transform_indices = @transform_0, window_bounds = array<i64: 8, 32>}, {pipeline_mode = #tpu.pipeline_mode<synchronous>, transform_indices = @transform_1, window_bounds = array<i64: 32, 64>}, {pipeline_mode = #tpu.pipeline_mode<synchronous>, transform_indices = @transform_2, window_bounds = array<i64: 1, 64>}, {pipeline_mode = #tpu.pipeline_mode<synchronous>, transform_indices = @transform_3, window_bounds = array<i64: 64, 64>}, {pipeline_mode = #tpu.pipeline_mode<synchronous>, transform_indices = @transform_4, window_bounds = array<i64: 1, 64>}, {pipeline_mode = #tpu.pipeline_mode<synchronous>, transform_indices = @transform_5, window_bounds = array<i64: 64, 128>}, {pipeline_mode = #tpu.pipeline_mode<synchronous>, transform_indices = @transform_6, window_bounds = array<i64: 1, 128>}, {pipeline_mode = #tpu.pipeline_mode<synchronous>, transform_indices = @transform_7, window_bounds = array<i64: 128, 256>}, {pipeline_mode = #tpu.pipeline_mode<synchronous>, transform_indices = @transform_8, window_bounds = array<i64: 1, 256>}, {transform_indices = @transform_9, window_bounds = array<i64: 8, 256>}]} {
    %c0 = arith.constant 0 : index
    %c0_0 = arith.constant 0 : index
    %0 = vector.load %arg1[%c0, %c0_0] : memref<8x32xf32, #tpu.memory_space<vmem>>, vector<8x32xf32>
    %c0_1 = arith.constant 0 : index
    %c0_2 = arith.constant 0 : index
    %1 = vector.load %arg2[%c0_1, %c0_2] : memref<32x64xf32, #tpu.memory_space<vmem>>, vector<32x64xf32>
    %cst = arith.constant dense<0.000000e+00> : vector<8x64xf32>
    %2 = tpu.matmul %0, %1, %cst {dimension_numbers = #tpu.dot_dimension_numbers<[1], [0], [0], [1], [0, 0, 1, 1], [], []>} : vector<8x32xf32>, vector<32x64xf32>, vector<8x64xf32> -> vector<8x64xf32>
    %c0_3 = arith.constant 0 : index
    %c0_4 = arith.constant 0 : index
    %3 = vector.load %arg3[%c0_3, %c0_4] : memref<1x64xf32, #tpu.memory_space<vmem>>, vector<1x64xf32>
    %4 = vector.broadcast %3 : vector<1x64xf32> to vector<8x64xf32>
    %5 = arith.addf %2, %4 : vector<8x64xf32>
    %cst_5 = arith.constant 0.000000e+00 : f32
    %6 = vector.broadcast %cst_5 : f32 to vector<8x64xf32>
    %7 = arith.cmpf oge, %5, %6 : vector<8x64xf32>
    %cst_6 = arith.constant 2.000000e-01 : f32
    %8 = vector.broadcast %cst_6 : f32 to vector<8x64xf32>
    %9 = arith.mulf %8, %5 : vector<8x64xf32>
    %10 = arith.select %7, %5, %9 : vector<8x64xi1>, vector<8x64xf32>
    %c0_7 = arith.constant 0 : index
    %c0_8 = arith.constant 0 : index
    %11 = vector.load %arg4[%c0_7, %c0_8] : memref<64x64xf32, #tpu.memory_space<vmem>>, vector<64x64xf32>
    %cst_9 = arith.constant dense<0.000000e+00> : vector<8x64xf32>
    %12 = tpu.matmul %10, %11, %cst_9 {dimension_numbers = #tpu.dot_dimension_numbers<[1], [0], [0], [1], [0, 0, 1, 1], [], []>} : vector<8x64xf32>, vector<64x64xf32>, vector<8x64xf32> -> vector<8x64xf32>
    %c0_10 = arith.constant 0 : index
    %c0_11 = arith.constant 0 : index
    %13 = vector.load %arg5[%c0_10, %c0_11] : memref<1x64xf32, #tpu.memory_space<vmem>>, vector<1x64xf32>
    %14 = vector.broadcast %13 : vector<1x64xf32> to vector<8x64xf32>
    %15 = arith.addf %12, %14 : vector<8x64xf32>
    %cst_12 = arith.constant 0.000000e+00 : f32
    %16 = vector.broadcast %cst_12 : f32 to vector<8x64xf32>
    %17 = arith.cmpf oge, %15, %16 : vector<8x64xf32>
    %cst_13 = arith.constant 2.000000e-01 : f32
    %18 = vector.broadcast %cst_13 : f32 to vector<8x64xf32>
    %19 = arith.mulf %18, %15 : vector<8x64xf32>
    %20 = arith.select %17, %15, %19 : vector<8x64xi1>, vector<8x64xf32>
    %c0_14 = arith.constant 0 : index
    %c0_15 = arith.constant 0 : index
    %21 = vector.load %arg6[%c0_14, %c0_15] : memref<64x128xf32, #tpu.memory_space<vmem>>, vector<64x128xf32>
    %cst_16 = arith.constant dense<0.000000e+00> : vector<8x128xf32>
    %22 = tpu.matmul %20, %21, %cst_16 {dimension_numbers = #tpu.dot_dimension_numbers<[1], [0], [0], [1], [0, 0, 1, 1], [], []>} : vector<8x64xf32>, vector<64x128xf32>, vector<8x128xf32> -> vector<8x128xf32>
    %c0_17 = arith.constant 0 : index
    %c0_18 = arith.constant 0 : index
    %23 = vector.load %arg7[%c0_17, %c0_18] : memref<1x128xf32, #tpu.memory_space<vmem>>, vector<1x128xf32>
    %24 = vector.broadcast %23 : vector<1x128xf32> to vector<8x128xf32>
    %25 = arith.addf %22, %24 : vector<8x128xf32>
    %cst_19 = arith.constant 0.000000e+00 : f32
    %26 = vector.broadcast %cst_19 : f32 to vector<8x128xf32>
    %27 = arith.cmpf oge, %25, %26 : vector<8x128xf32>
    %cst_20 = arith.constant 2.000000e-01 : f32
    %28 = vector.broadcast %cst_20 : f32 to vector<8x128xf32>
    %29 = arith.mulf %28, %25 : vector<8x128xf32>
    %30 = arith.select %27, %25, %29 : vector<8x128xi1>, vector<8x128xf32>
    %c0_21 = arith.constant 0 : index
    %c0_22 = arith.constant 0 : index
    %31 = vector.load %arg8[%c0_21, %c0_22] : memref<128x256xf32, #tpu.memory_space<vmem>>, vector<128x256xf32>
    %cst_23 = arith.constant dense<0.000000e+00> : vector<8x256xf32>
    %32 = tpu.matmul %30, %31, %cst_23 {dimension_numbers = #tpu.dot_dimension_numbers<[1], [0], [0], [1], [0, 0, 1, 1], [], []>} : vector<8x128xf32>, vector<128x256xf32>, vector<8x256xf32> -> vector<8x256xf32>
    %c0_24 = arith.constant 0 : index
    %c0_25 = arith.constant 0 : index
    %33 = vector.load %arg9[%c0_24, %c0_25] : memref<1x256xf32, #tpu.memory_space<vmem>>, vector<1x256xf32>
    %34 = vector.broadcast %33 : vector<1x256xf32> to vector<8x256xf32>
    %35 = arith.addf %32, %34 : vector<8x256xf32>
    %c0_26 = arith.constant 0 : index
    %c0_27 = arith.constant 0 : index
    %36 = vector.load %arg10[%c0_26, %c0_27] : memref<8x256xf32, #tpu.memory_space<vmem>>, vector<8x256xf32>
    tpu.vector_store %arg10[%c0_26, %c0_27], %35 {strides = array<i32>} : memref<8x256xf32, #tpu.memory_space<vmem>>, vector<8x256xf32>,
    return
  }
  func.func @transform_0(%arg0: i32) -> (i32, i32) {
    %c0_i32 = arith.constant 0 : i32
    %c0_i32_0 = arith.constant 0 : i32
    return %arg0, %c0_i32 : i32, i32
  }
  func.func @transform_1(%arg0: i32) -> (i32, i32) {
    %c0_i32 = arith.constant 0 : i32
    %c0_i32_0 = arith.constant 0 : i32
    %c0_i32_1 = arith.constant 0 : i32
    return %c0_i32, %c0_i32_0 : i32, i32
  }
  func.func @transform_2(%arg0: i32) -> (i32, i32) {
    %c0_i32 = arith.constant 0 : i32
    %c0_i32_0 = arith.constant 0 : i32
    %c0_i32_1 = arith.constant 0 : i32
    return %c0_i32, %c0_i32_0 : i32, i32
  }
  func.func @transform_3(%arg0: i32) -> (i32, i32) {
    %c0_i32 = arith.constant 0 : i32
    %c0_i32_0 = arith.constant 0 : i32
    %c0_i32_1 = arith.constant 0 : i32
    return %c0_i32, %c0_i32_0 : i32, i32
  }
  func.func @transform_4(%arg0: i32) -> (i32, i32) {
    %c0_i32 = arith.constant 0 : i32
    %c0_i32_0 = arith.constant 0 : i32
    %c0_i32_1 = arith.constant 0 : i32
    return %c0_i32, %c0_i32_0 : i32, i32
  }
  func.func @transform_5(%arg0: i32) -> (i32, i32) {
    %c0_i32 = arith.constant 0 : i32
    %c0_i32_0 = arith.constant 0 : i32
    %c0_i32_1 = arith.constant 0 : i32
    return %c0_i32, %c0_i32_0 : i32, i32
  }
  func.func @transform_6(%arg0: i32) -> (i32, i32) {
    %c0_i32 = arith.constant 0 : i32
    %c0_i32_0 = arith.constant 0 : i32
    %c0_i32_1 = arith.constant 0 : i32
    return %c0_i32, %c0_i32_0 : i32, i32
  }
  func.func @transform_7(%arg0: i32) -> (i32, i32) {
    %c0_i32 = arith.constant 0 : i32
    %c0_i32_0 = arith.constant 0 : i32
    %c0_i32_1 = arith.constant 0 : i32
    return %c0_i32, %c0_i32_0 : i32, i32
  }
  func.func @transform_8(%arg0: i32) -> (i32, i32) {
    %c0_i32 = arith.constant 0 : i32
    %c0_i32_0 = arith.constant 0 : i32
    %c0_i32_1 = arith.constant 0 : i32
    return %c0_i32, %c0_i32_0 : i32, i32
  }
  func.func @transform_9(%arg0: i32) -> (i32, i32) {
    %c0_i32 = arith.constant 0 : i32
    %c0_i32_0 = arith.constant 0 : i32
    return %arg0, %c0_i32 : i32, i32
  }
}

</mosaic_0001>

<bundles_post_ra>
// kernel: tpu_custom_call.1
= control target key start
LH: loop header
LB: loop body
LE: loop exit
PB: predicated region body
PF: predicated region fallthrough
CT: control target
= control target key end

     0   :  { %14 = vsyncpa [#allocation3], 0  ;;  %s969_s0 = inlined_call_operand.hbm [shape: f32[8,32], index: 0, kind: input, shape index: {}]   ;;  %s970_s1 = inlined_call_operand.hbm [shape: f32[32,64], index: 1, kind: input, shape index: {}]   ;;  %s971_s2 = inlined_call_operand.vmem [shape: f32[1,64], index: 2, kind: input, shape index: {}]   ;;  %s972_s3 = inlined_call_operand.hbm [shape: f32[64,64], index: 3, kind: input, shape index: {}]   ;;  %s973_s4 = inlined_call_operand.vmem [shape: f32[1,64], index: 4, kind: input, shape index: {}]   ;;  %s974_s5 = inlined_call_operand.hbm [shape: f32[64,128], index: 5, kind: input, shape index: {}]   ;;  %s975_s6 = inlined_call_operand.vmem [shape: f32[1,128], index: 6, kind: input, shape index: {}]   ;;  %s976_s7 = inlined_call_operand.hbm [shape: f32[128,256], index: 7, kind: input, shape index: {}]   ;;  %s977_s8 = inlined_call_operand.vmem [shape: f32[1,256], index: 8, kind: input, shape index: {}]   ;;  %s978_s9 = inlined_call_operand.hbm [shape: f32[8,256], index: 9, kind: output, shape index: {}]  }
   0x1   :  { %15 = vsyncpa [#allocation6], 0 }
   0x2   :  { %16 = vsyncpa [#allocation9], 0 }
   0x3   :  { %17 = vsyncpa [#allocation4], 0  ;;  %s798_s30 = smov [#allocation5]   ;;  %s658_s13 = scalar_lea.hbm %s970_s1, 512 }
   0x4   :  { %s33_s10 = sshll.u32 %s798_s30, 4  ;;  %p659_p0 = scmp.ne.s32.totalorder %s970_s1, %s658_s13  ;;  %s34_s10 = int_to_ptr.vmem [resolvable:$true] %s33_s10 }
   0x5   :  { %p662_p1 = scmp.lt.u32.totalorder %s658_s13, %s970_s1 }
   0x7   :  { %p664_p2 = pnand %p662_p1, %p659_p0 }
   0x9   :  { %667 = shalt.err (!%p664_p2)
}
   0xa   :  { %s668_s18 = scalar_lea.vmem %s34_s10, 512  ;;  %p673_p4 = scmp.lt.s32.totalorder %s34_s10, %s34_s10 }
   0xb   :  { %p669_p3 = scmp.ne.s32.totalorder %s34_s10, %s668_s18  ;;  %p674_p5 = scmp.lt.s32.totalorder %s668_s18, %s668_s18 }
   0xd   :  { %p675_p6 = por %p674_p5, %p673_p4 }
   0xf   :  { %p676_p7 = pnand %p675_p6, %p669_p3 }
  0x11   :  { %679 = shalt.err (!%p676_p7)
}
  0x12   :  { %s799_s19 = smov 128   ;;  %s800_s20 = smov 8  }
  0x13   :  { %39 = dma.hbm_to_vmem [thread:$0]  %s970_s1, 512, %s34_s10, [#allocation6], %s799_s19, %s799_s19, %s800_s20  }
  0x14   :  { %s801_s23 = smov [#allocation8]   ;;  %s802_s25 = smov [#allocation2]  }
  0x15   :  { %s61_s24 = sshll.u32 %s801_s23, 4  ;;  %s24_s26 = sshll.u32 %s802_s25, 4  ;;  %s62_s24 = int_to_ptr.vmem [resolvable:$true] %s61_s24  ;;  %s25_s26 = int_to_ptr.vmem [resolvable:$true] %s24_s26 }
  0x16   :  { %s680_s29 = scalar_lea.hbm %s974_s5, 1024 }
  0x17   :  { %p681_p8 = scmp.ne.s32.totalorder %s974_s5, %s680_s29  ;;  %p684_p9 = scmp.lt.u32.totalorder %s680_s29, %s974_s5 }
  0x19   :  { %p686_p10 = pnand %p684_p9, %p681_p8 }
  0x1b   :  { %689 = shalt.err (!%p686_p10)
}
  0x1c   :  { %s690_s1 = scalar_lea.vmem %s62_s24, 1024  ;;  %p695_p12 = scmp.lt.s32.totalorder %s62_s24, %s62_s24 }
  0x1d   :  { %p691_p11 = scmp.ne.s32.totalorder %s62_s24, %s690_s1  ;;  %p696_p13 = scmp.lt.s32.totalorder %s690_s1, %s690_s1 }
  0x1f   :  { %p697_p0 = por %p696_p13, %p695_p12 }
  0x21   :  { %p698_p1 = pnand %p697_p0, %p691_p11 }
  0x23   :  { %701 = shalt.err (!%p698_p1)
}
  0x24   :  { %67 = dma.hbm_to_vmem [thread:$0]  %s974_s5, 1024, %s62_s24, [#allocation9], %s799_s19, %s799_s19, %s800_s20  }
  0x25   :  { %s702_s17 = scalar_lea.hbm %s969_s0, 128 }
  0x26   :  { %p703_p2 = scmp.ne.s32.totalorder %s969_s0, %s702_s17  ;;  %p706_p3 = scmp.lt.u32.totalorder %s702_s17, %s969_s0 }
  0x28   :  { %p708_p4 = pnand %p706_p3, %p703_p2 }
  0x2a   :  { %711 = shalt.err (!%p708_p4)
}
  0x2b   :  { %s712_s25 = scalar_lea.vmem %s25_s26, 128  ;;  %p717_p6 = scmp.lt.s32.totalorder %s25_s26, %s25_s26 }
  0x2c   :  { %p713_p5 = scmp.ne.s32.totalorder %s25_s26, %s712_s25  ;;  %p718_p7 = scmp.lt.s32.totalorder %s712_s25, %s712_s25 }
  0x2e   :  { %p719_p8 = por %p718_p7, %p717_p6 }
  0x30   :  { %p720_p9 = pnand %p719_p8, %p713_p5 }
  0x32   :  { %723 = shalt.err (!%p720_p9)
}
  0x33   :  { %27 = dma.hbm_to_vmem [thread:$0]  %s969_s0, 128, %s25_s26, [#allocation3]  }
  0x34   :  { %s803_s27 = smov [#allocation7]   ;;  %s804_s29 = smov [#allocation10]  }
  0x35   :  { %s47_s28 = sshll.u32 %s803_s27, 4  ;;  %s75_s30 = sshll.u32 %s804_s29, 4  ;;  %s48_s28 = int_to_ptr.vmem [resolvable:$true] %s47_s28  ;;  %s76_s30 = int_to_ptr.vmem [resolvable:$true] %s75_s30 }
  0x36   :  { %s724_s13 = scalar_lea.hbm %s972_s3, 1024 }
  0x37   :  { %p725_p10 = scmp.ne.s32.totalorder %s972_s3, %s724_s13  ;;  %p728_p11 = scmp.lt.u32.totalorder %s724_s13, %s972_s3 }
  0x39   :  { %p730_p12 = pnand %p728_p11, %p725_p10 }
  0x3b   :  { %733 = shalt.err (!%p730_p12)
}
  0x3c   :  { %s734_s0 = scalar_lea.vmem %s48_s28, 1024  ;;  %p739_p0 = scmp.lt.s32.totalorder %s48_s28, %s48_s28 }
  0x3d   :  { %p735_p13 = scmp.ne.s32.totalorder %s48_s28, %s734_s0  ;;  %p740_p1 = scmp.lt.s32.totalorder %s734_s0, %s734_s0 }
  0x3f   :  { %p741_p2 = por %p740_p1, %p739_p0 }
  0x41   :  { %p742_p3 = pnand %p741_p2, %p735_p13 }
  0x43   :  { %745 = shalt.err (!%p742_p3)
}
  0x44   :  { %53 = dma.hbm_to_vmem [thread:$0]  %s972_s3, 1024, %s48_s28, [#allocation6], %s799_s19, %s799_s19, %s800_s20  }
  0x45   :  { %s746_s21 = scalar_lea.hbm %s976_s7, 4096 }
  0x46   :  { %p747_p4 = scmp.ne.s32.totalorder %s976_s7, %s746_s21  ;;  %p750_p5 = scmp.lt.u32.totalorder %s746_s21, %s976_s7 }
  0x48   :  { %p752_p6 = pnand %p750_p5, %p747_p4 }
  0x4a   :  { %755 = shalt.err (!%p752_p6)
}
  0x4b   :  { %s756_s24 = scalar_lea.vmem %s76_s30, 4096  ;;  %p761_p8 = scmp.lt.s32.totalorder %s76_s30, %s76_s30 }
  0x4c   :  { %p757_p7 = scmp.ne.s32.totalorder %s76_s30, %s756_s24  ;;  %p762_p9 = scmp.lt.s32.totalorder %s756_s24, %s756_s24 }
  0x4e   :  { %p763_p10 = por %p762_p9, %p761_p8 }
  0x50   :  { %p764_p11 = pnand %p763_p10, %p757_p7 }
  0x52   :  { %767 = shalt.err (!%p764_p11)
}
  0x53   :  { %s805_s3 = smov 256   ;;  %s806_s19 = smov 16  }
  0x54   :  { %81 = dma.hbm_to_vmem [thread:$0]  %s976_s7, 4096, %s76_s30, [#allocation9], %s805_s3, %s805_s3, %s806_s19  }
  0x55   :  { %790 = dma.done.wait [#allocation3], 128  }
  0x56   :  { %791 = vsyncadd [#allocation3], 4294967168 }
  0x57   :  { %792 = dma.done.wait [#allocation6], 1536  }
  0x58   :  { %793 = vsyncadd [#allocation6], 4294965760 }
  0x59   :  { %794 = dma.done.wait [#allocation9], 5120  }
  0x5a   :  { %795 = vsyncadd [#allocation9], 4294962176  ;;  %v807_v0 = vmov 0.0|0.0   ;;  %vm808_vm0 = vmmov 0   ;;  %v809_v1 = vmov 0.0   ;;  %v100_v2 = vld [vmem:[#allocation5] sm:$0xff] }
  0x5b   :  { %583 = vmatprep.subr.bf16.mxu0 %v807_v0  ;;  %542 = vmatprep.mubr.msk.f32.mxu0 %vm808_vm0, %v809_v1  ;;  %v101_v3 = vld [vmem:[#allocation5 + $0x8] sm:$0xff]  ;;  %v102_v4 = vld [vmem:[#allocation5 + $0x10] sm:$0xff]  ;;  %v103_v6 = vld [vmem:[#allocation5 + $0x18] sm:$0xff]  ;;  %vm111_vm1 = vcmask 261120   ;;  %vm203_vm3 = vcmask 523264   ;;  %s810_s13 = smov [#allocation11]  }
  0x5c   :  { %479 = vmatprep.mubr.f32.mxu1 %v809_v1  ;;  %v584_v5 = vpack.c.bf16 %v101_v3, %v100_v2  ;;  %v587_v7 = vpack.c.bf16 %v103_v6, %v102_v4  ;;  %v188_v8 = vld [vmem:[#allocation7] sm:$0xff]  ;;  %v189_v9 = vld [vmem:[#allocation7 + $0x8] sm:$0xff]  ;;  %v99_v10 = vld [vmem:[#allocation2] sm:$0xff]  ;;  %s494_s1 = sshll.u32 %s810_s13, 4  ;;  %s495_s1 = int_to_ptr.vmem [resolvable:$true] %s494_s1 }
  0x5d   :  { %v590_v11 = vpack.c.bf16 %v189_v9, %v188_v8  ;;  %v190_v12 = vld [vmem:[#allocation7 + $0x10] sm:$0xff]  ;;  %v191_v13 = vld [vmem:[#allocation7 + $0x18] sm:$0xff]  ;;  %v192_v15 = vld [vmem:[#allocation7 + $0x20] sm:$0xff]  ;;  %p773_p13 = scmp.lt.s32.totalorder %s495_s1, %s495_s1 }
  0x5e   :  { %585 = vmatpush3.bf16.msra.mxu0 %v584_v5  ;;  %v593_v14 = vpack.c.bf16 %v191_v13, %v190_v12  ;;  %v193_v16 = vld [vmem:[#allocation7 + $0x28] sm:$0xff]  ;;  %v194_v18 = vld [vmem:[#allocation7 + $0x30] sm:$0xff]  ;;  %v195_v19 = vld [vmem:[#allocation7 + $0x38] sm:$0xff] }
  0x5f   :  { %586 = vmatprep.subr.bf16.mxu0 %v807_v0  ;;  %v596_v17 = vpack.c.bf16 %v193_v16, %v192_v15  ;;  %v599_v20 = vpack.c.bf16 %v195_v19, %v194_v18  ;;  %v505_v21 = vld [vmem:[%s971_s2] ss:$0 sm:$0xff]  ;;  %v280_v23 = vld [vmem:[#allocation8] sm:$0xff]  ;;  %v281_v24 = vld [vmem:[#allocation8 + $0x8] sm:$0xff] }
  0x60   :  { %v602_v28 = vpack.c.bf16 %v281_v24, %v280_v23  ;;  %v282_v29 = vld [vmem:[#allocation8 + $0x10] sm:$0xff]  ;;  %v283_v30 = vld [vmem:[#allocation8 + $0x18] sm:$0xff]  ;;  %v284_v33 = vld [vmem:[#allocation8 + $0x20] sm:$0xff] }
  0x61   :  { %v605_v32 = vpack.c.bf16 %v283_v30, %v282_v29  ;;  %v285_v34 = vld [vmem:[#allocation8 + $0x28] sm:$0xff]  ;;  %v286_v36 = vld [vmem:[#allocation8 + $0x30] sm:$0xff]  ;;  %v287_v37 = vld [vmem:[#allocation8 + $0x38] sm:$0xff] }
  0x62   :  { %588 = vmatpush3.bf16.msra.mxu0 %v587_v7  ;;  %v608_v35 = vpack.c.bf16 %v285_v34, %v284_v33  ;;  %v611_v38 = vpack.c.bf16 %v287_v37, %v286_v36  ;;  %v372_v39 = vld [vmem:[#allocation10 + $0x8] sm:$0xff]  ;;  %v374_v40 = vld [vmem:[#allocation10 + $0x18] sm:$0xff]  ;;  %v371_v41 = vld [vmem:[#allocation10] sm:$0xff] }
  0x63   :  { %589 = vmatprep.subr.bf16.mxu0 %v807_v0  ;;  %v613_v42 = vpack.c.bf16 %v374_v40, %v372_v39  ;;  %v373_v43 = vld [vmem:[#allocation10 + $0x10] sm:$0xff]  ;;  %v376_v44 = vld [vmem:[#allocation10 + $0x28] sm:$0xff]  ;;  %v378_v45 = vld [vmem:[#allocation10 + $0x38] sm:$0xff] }
  0x64   :  { %v615_v46 = vpack.c.bf16 %v373_v43, %v371_v41  ;;  %v617_v47 = vpack.c.bf16 %v378_v45, %v376_v44  ;;  %v375_v48 = vld [vmem:[#allocation10 + $0x20] sm:$0xff]  ;;  %v377_v49 = vld [vmem:[#allocation10 + $0x30] sm:$0xff]  ;;  %v380_v50 = vld [vmem:[#allocation10 + $0x48] sm:$0xff] }
  0x65   :  { %543 = vmatmul.mubr.msk.f32.vlgmr.msra.gmra.mrb[0].mxu0 %vm111_vm1, %v99_v10  ;;  %614 = vmatprep.subr.bf16.mxu1 %v613_v42  ;;  %v382_v51 = vld [vmem:[#allocation10 + $0x58] sm:$0xff]  ;;  %v619_v52 = vpack.c.bf16 %v377_v49, %v375_v48  ;;  %v379_v54 = vld [vmem:[#allocation10 + $0x40] sm:$0xff]  ;;  %v381_v55 = vld [vmem:[#allocation10 + $0x50] sm:$0xff] }
  0x66   :  { %591 = vmatpush3.bf16.msra.mxu0 %v590_v11  ;;  %561 = vmatprep.mubr.msk.f32.mxu0 %vm808_vm0, %v809_v1  ;;  %v621_v53 = vpack.c.bf16 %v382_v51, %v380_v50  ;;  %v384_v56 = vld [vmem:[#allocation10 + $0x68] sm:$0xff]  ;;  %v386_v57 = vld [vmem:[#allocation10 + $0x78] sm:$0xff]  ;;  %v623_v58 = vpack.c.bf16 %v381_v55, %v379_v54  ;;  %v383_v60 = vld [vmem:[#allocation10 + $0x60] sm:$0xff] }
  0x67   :  { %592 = vmatprep.subr.bf16.mxu0 %v807_v0  ;;  %616 = vmatpush1.bf16.msra.mxu1 %v615_v46  ;;  %v625_v59 = vpack.c.bf16 %v386_v57, %v384_v56  ;;  %v385_v61 = vld [vmem:[#allocation10 + $0x70] sm:$0xff]  ;;  %v388_v62 = vld [vmem:[#allocation10 + $0x88] sm:$0xff]  ;;  %v390_v63 = vld [vmem:[#allocation10 + $0x98] sm:$0xff] }
  0x68   :  { %618 = vmatprep.subr.bf16.mxu1 %v617_v47  ;;  %v387_v2 = vld [vmem:[#allocation10 + $0x80] sm:$0xff]  ;;  %v389_v3 = vld [vmem:[#allocation10 + $0x90] sm:$0xff]  ;;  %v392_v4 = vld [vmem:[#allocation10 + $0xa8] sm:$0xff] }
  0x69   :  { %v394_v5 = vld [vmem:[#allocation10 + $0xb8] sm:$0xff]  ;;  %v631_v6 = vpack.c.bf16 %v389_v3, %v387_v2  ;;  %v391_v8 = vld [vmem:[#allocation10 + $0xa0] sm:$0xff]  ;;  %v393_v9 = vld [vmem:[#allocation10 + $0xb0] sm:$0xff] }
  0x6a   :  { %594 = vmatpush3.bf16.msra.mxu0 %v593_v14  ;;  %v633_v7 = vpack.c.bf16 %v394_v5, %v392_v4  ;;  %v396_v10 = vld [vmem:[#allocation10 + $0xc8] sm:$0xff]  ;;  %v398_v11 = vld [vmem:[#allocation10 + $0xd8] sm:$0xff]  ;;  %v635_v12 = vpack.c.bf16 %v393_v9, %v391_v8  ;;  %v395_v14 = vld [vmem:[#allocation10 + $0xc0] sm:$0xff] }
  0x6b   :  { %595 = vmatprep.subr.bf16.mxu0 %v807_v0  ;;  %620 = vmatpush1.bf16.msra.mxu1 %v619_v52  ;;  %v637_v13 = vpack.c.bf16 %v398_v11, %v396_v10  ;;  %v397_v15 = vld [vmem:[#allocation10 + $0xd0] sm:$0xff]  ;;  %v400_v23 = vld [vmem:[#allocation10 + $0xe8] sm:$0xff]  ;;  %v402_v24 = vld [vmem:[#allocation10 + $0xf8] sm:$0xff] }
  0x6c   :  { %622 = vmatprep.subr.bf16.mxu1 %v621_v53  ;;  %v639_v16 = vpack.c.bf16 %v397_v15, %v395_v14  ;;  %v509_v29 = vld [vmem:[%s975_s6] ss:$0 sm:$0xff]  ;;  %s768_s6 = scalar_lea.vmem %s495_s1, 256 }
  0x6d   :  { %p769_p12 = scmp.ne.s32.totalorder %s495_s1, %s768_s6  ;;  %p774_p0 = scmp.lt.s32.totalorder %s768_s6, %s768_s6 }
  0x6e   :  { %597 = vmatpush3.bf16.msra.mxu0 %v596_v17  ;;  %v507_v17 = vld [vmem:[%s973_s4] ss:$0 sm:$0xff] }
  0x6f   :  { %598 = vmatprep.subr.bf16.mxu0 %v807_v0  ;;  %624 = vmatpush1.bf16.msra.mxu1 %v623_v58  ;;  %p775_p1 = por %p774_p0, %p773_p13 }
  0x70   :  { %626 = vmatprep.subr.bf16.mxu1 %v625_v59 }
  0x71   :  { %p776_p2 = pnand %p775_p1, %p769_p12 }
  0x72   :  { %600 = vmatpush3.bf16.msra.mxu0 %v599_v20 }
  0x73   :  { %601 = vmatprep.subr.bf16.mxu0 %v807_v0 }
 0x138   :  { %v181_v22 = vpop.f32.mrb[0].mxu0 }
 0x139   :  { %v182_v25 = vadd.f32 %v505_v21, %v181_v22  ;;  %v544_v26 = vpop.f32.mrb[1].mxu0 }
 0x13a   :  { %v399_v26 = vld [vmem:[#allocation10 + $0xe0] sm:$0xff] }
 0x13b   :  { %vm185_vm2 = vcmp.ge.f32.partialorder %v182_v25, 0.0  ;;  %v186_v27 = vmul.f32 0.2, %v182_v25 }
 0x13d   :  { %v187_v31 = vsel %vm185_vm2, %v182_v25, %v186_v27  ;;  %v641_v25 = vpack.c.bf16 %v402_v24, %v400_v23  ;;  %v401_v27 = vld [vmem:[#allocation10 + $0xf0] sm:$0xff] }
 0x13e   :  { %562 = vmatmul.mubr.msk.f32.vlgmr.msra.gmra.mrb[2].mxu0 %vm203_vm3, %v187_v31 }
 0x13f   :  { %603 = vmatpush3.bf16.msra.mxu0 %v602_v28  ;;  %580 = vmatprep.mubr.msk.f32.mxu0 %vm808_vm0, %v809_v1  ;;  %v629_v1 = vpack.c.bf16 %v390_v63, %v388_v62  ;;  %v643_v28 = vpack.c.bf16 %v401_v27, %v399_v26 }
 0x140   :  { %604 = vmatprep.subr.bf16.mxu0 %v807_v0 }
 0x143   :  { %606 = vmatpush3.bf16.msra.mxu0 %v605_v32 }
 0x144   :  { %607 = vmatprep.subr.bf16.mxu0 %v807_v0 }
 0x147   :  { %609 = vmatpush3.bf16.msra.mxu0 %v608_v35  ;;  %v405_v35 = vlaneseq }
 0x148   :  { %610 = vmatprep.subr.bf16.mxu0 %v807_v0  ;;  %v627_v0 = vpack.c.bf16 %v385_v61, %v383_v60 }
 0x149   :  { %v406_v36 = vshrl.u32 %v405_v35, 7 }
 0x14a   :  { %628 = vmatpush1.bf16.msra.mxu1 %v627_v0 }
 0x14b   :  { %612 = vmatpush3.bf16.msra.mxu0 %v611_v38  ;;  %630 = vmatprep.subr.bf16.mxu1 %v629_v1  ;;  %v407_v37 = vsub.s32 0, %v406_v36  ;;  %v403_v38 = vld [vmem:[%s977_s8] sm:$0x3]  ;;  %v411_v39 = vsub.s32 1, %v406_v36 }
 0x14d   :  { %v408_v40 = vrot.slane %v403_v38, %v407_v37  ;;  %v412_v41 = vrot.slane %v403_v38, %v411_v39 }
 0x14e   :  { %632 = vmatpush1.bf16.msra.mxu1 %v631_v6 }
 0x14f   :  { %634 = vmatprep.subr.bf16.mxu1 %v633_v7 }
 0x152   :  { %636 = vmatpush1.bf16.msra.mxu1 %v635_v12 }
 0x153   :  { %638 = vmatprep.subr.bf16.mxu1 %v637_v13 }
 0x156   :  { %640 = vmatpush1.bf16.msra.mxu1 %v639_v16 }
 0x157   :  { %642 = vmatprep.subr.bf16.mxu1 %v641_v25 }
 0x15a   :  { %644 = vmatpush1.bf16.msra.mxu1 %v643_v28 }
 0x211   :  { %v273_v18 = vpop.f32.mrb[2].mxu0 }
 0x212   :  { %v274_v19 = vadd.f32 %v507_v17, %v273_v18  ;;  %v563_v20 = vpop.f32.mrb[3].mxu0 }
 0x214   :  { %vm277_vm4 = vcmp.ge.f32.partialorder %v274_v19, 0.0  ;;  %v278_v21 = vmul.f32 0.2, %v274_v19 }
 0x216   :  { %v279_v22 = vsel %vm277_vm4, %v274_v19, %v278_v21 }
 0x217   :  { %581 = vmatmul.mubr.msk.f32.vlgmr.msra.gmra.mrb[4].mxu0 %vm203_vm3, %v279_v22 }
 0x2ea   :  { %v364_v30 = vpop.f32.mrb[4].mxu0 }
 0x2eb   :  { %v365_v31 = vadd.f32 %v509_v29, %v364_v30  ;;  %v582_v32 = vpop.f32.mrb[5].mxu0 }
 0x2ed   :  { %v369_v33 = vmul.f32 0.2, %v365_v31  ;;  %vm368_vm5 = vcmp.ge.f32.partialorder %v365_v31, 0.0 }
 0x2ef   :  { %v370_v34 = vsel %vm368_vm5, %v365_v31, %v369_v33 }
 0x2f0   :  { %480 = vmatmul.mubr.f32.vlgmr.msra.gmra.mrb[0].mxu1 %v370_v34 }
 0x3c3   :  { %v481_v42 = vpop.f32.mrb[0].mxu1 }
 0x3c4   :  { %v482_v43 = vadd.f32 %v481_v42, %v408_v40  ;;  %v483_v44 = vpop.f32.mrb[1].mxu1 }
 0x3c5   :  { %v484_v45 = vadd.f32 %v483_v44, %v412_v41 }
 0x3c6   :  { %486 = vst [vmem:[#allocation11] sm:$0xff] %v482_v43 }
 0x3c7   :  { %487 = vst [vmem:[#allocation11 + $0x8] sm:$0xff] %v484_v45 }
 0x3c8   :  { %779 = shalt.err (!%p776_p2)
}
 0x3c9   :  { %s780_s14 = scalar_lea.hbm %s978_s9, 256 }
 0x3ca   :  { %p781_p3 = scmp.ne.s32.totalorder %s978_s9, %s780_s14  ;;  %p784_p4 = scmp.lt.u32.totalorder %s780_s14, %s978_s9 }
 0x3cc   :  { %p786_p5 = pnand %p784_p4, %p781_p3 }
 0x3ce   :  { %789 = shalt.err (!%p786_p5)
}
 0x3cf   :  { %497 = dma.vmem_to_hbm [thread:$0]  %s495_s1, 256, %s978_s9, [#allocation4]  }
 0x3d0   :  { %796 = dma.done.wait [#allocation4], 256  }
 0x3d1   :  { %797 = vsyncadd [#allocation4], 4294967040 }
 0x3d2   :  { %501 = vsyncpa [#allocation3], 1 }
 0x3d3   :  { %502 = vsyncpa [#allocation6], 1 }
 0x3d4   :  { %503 = vsyncpa [#allocation9], 1 }
 0x3d5   :  { %504 = vsyncpa [#allocation4], 1 }

</bundles_post_ra>
